<compile_context>
chip_gen: v5e
topology: v5e:2x2
jax: 0.10.0
libtpu: 0.0.40
codegen_flags: <defaults>
</compile_context>

<pallas_src>
import jax
import jax.numpy as jnp
from jax.experimental import pallas as pl
from jax.experimental.pallas import tpu as pltpu


_QA_8B_LO = -1.0
_QA_8B_HI = (2.0 ** 7 - 1.0) / (2.0 ** 7)   # 127/128, exactly representable


def _round_up(v, m):
    return ((v + m - 1) // m) * m


def _largest_aligned_divisor(size, cap, align=128):
    """Largest multiple of `align` that divides `size` and is <= cap (size % align == 0)."""
    best = align
    t = align
    limit = min(cap, size)
    while t <= limit:
        if size % t == 0:
            best = t
        t += align
    return best


def _fc_fpt_kernel(x_ref, w_ref, b_ref, o_ref, acc_ref):
    """One (tm, tn) output tile, accumulated over the K grid axis (innermost)."""
    k = pl.program_id(2)

    @pl.when(k == 0)
    def _():
        acc_ref[...] = jnp.zeros_like(acc_ref)

    # x tile: (tm, tk); w tile: (tk, tn) -- canonical (M,K)x(K,N) MXU matmul,
    # no per-tile transpose needed.
    acc_ref[...] += jnp.dot(x_ref[...], w_ref[...],
                            preferred_element_type=jnp.float32)

    # Epilogue only on the last K step: bias add + 8-bit QA clamp in f32.
    @pl.when(k == pl.num_programs(2) - 1)
    def _():
        y = acc_ref[...] + b_ref[...]            # (1, tn) broadcasts over tm rows
        o_ref[...] = jnp.clip(y, _QA_8B_LO, _QA_8B_HI).astype(o_ref.dtype)


def prepare_fc_fpt_params(weight, bias, *,
                          compute_dtype=jnp.bfloat16,
                          tn_max=512, tk_max=2048):
    """One-time (model-init) weight/bias preparation.

    weight : [out_features, in_features]   (PyTorch nn.Linear layout)
    bias   : [out_features]
    Returns a dict with the padded, transposed, cast weight (Kp, Fp), the padded
    f32 bias (1, Fp), and the N/K tile plan.  Keep the result around and reuse it
    for every forward call -- this is the hoisted per-call pad/cast from the
    perf review.
    """
    F, K = weight.shape
    assert bias.shape == (F,)

    Kp = _round_up(K, 128)
    Fp = _round_up(F, 128)

    # Largest aligned divisor -> fewest K steps without extra K padding.
    tk = _largest_aligned_divisor(Kp, tk_max, 128)
    # Prefer >= 2 N tiles when Fp allows it (v7x megacore); otherwise one tile.
    tn_cap = min(tn_max, Fp // 2) if Fp >= 256 else Fp
    tn = _largest_aligned_divisor(Fp, max(tn_cap, 128), 128)

    # Pre-transpose to (K, F), cast to the narrow compute dtype, zero-pad once.
    wp = jnp.zeros((Kp, Fp), compute_dtype).at[:K, :F].set(
        weight.T.astype(compute_dtype))
    bp = jnp.zeros((1, Fp), jnp.float32).at[0, :F].set(bias.astype(jnp.float32))

    return {"wp": wp, "bp": bp, "K": K, "F": F, "Kp": Kp, "Fp": Fp,
            "tk": tk, "tn": tn, "compute_dtype": compute_dtype}


def fullyconnected_fpt_forward(x, params, *, tm_max=1024, weight_buffers=2):
    """shallow_base_layer.forward, 'fpt' mode, fullyconnected instance.

    x      : [B, in_features] float
    params : output of prepare_fc_fpt_params (prepared once at model init)
    returns: [B, out_features] float32
    """
    B, K = x.shape
    assert K == params["K"], "in_features mismatch vs prepared weight"
    F = params["F"]
    Kp, Fp = params["Kp"], params["Fp"]
    tk, tn = params["tk"], params["tn"]
    compute_dtype = params["compute_dtype"]
    wp, bp = params["wp"], params["bp"]

    # M tile only needs sublane (8) alignment; collapse the M grid to a single
    # tile whenever the padded batch fits so the weight is streamed once.
    tm = min(_round_up(tm_max, 8), _round_up(B, 8))
    Bp = _round_up(B, tm)

    # Per-call work: pad + cast the activations only.
    xp = jnp.zeros((Bp, Kp), compute_dtype).at[:B, :K].set(x.astype(compute_dtype))

    grid = (Bp // tm, Fp // tn, Kp // tk)
    m_tiles = grid[0]

    # Scoped-VMEM budget from the actual tile plan (kept under v7x's 64 MiB).
    in_bytes = jnp.dtype(compute_dtype).itemsize
    working = (2 * tm * tk * in_bytes                    # double-buffered x tiles
               + weight_buffers * tk * tn * in_bytes     # buffered weight tiles
               + 2 * tm * tn * 4                         # double-buffered out tile
               + tm * tn * 4                             # f32 accumulator scratch
               + 2 * 8 * tn * 4)                         # bias tile (sublane-padded)
    vmem_limit = int(min(64 * 1024 * 1024, max(2 * working, 16 * 1024 * 1024)))

    # Advisory cost hint so XLA schedules the x pad/cast sensibly around the call.
    cost = pl.CostEstimate(
        flops=2 * Bp * Fp * Kp,
        transcendentals=0,
        bytes_accessed=(Bp * Kp * in_bytes            # x read
                        + m_tiles * Kp * Fp * in_bytes  # weight read (per M tile)
                        + Fp * 4                        # bias read
                        + Bp * Fp * 4))                 # output write

    if weight_buffers > 2:
        w_spec = pl.BlockSpec((tk, tn), lambda i, j, k: (k, j),
                              pipeline_mode=pl.Buffered(weight_buffers))
    else:
        w_spec = pl.BlockSpec((tk, tn), lambda i, j, k: (k, j))

    yp = pl.pallas_call(
        _fc_fpt_kernel,
        out_shape=jax.ShapeDtypeStruct((Bp, Fp), jnp.float32),
        grid_spec=pltpu.PrefetchScalarGridSpec(
            num_scalar_prefetch=0,
            grid=grid,
            in_specs=[
                pl.BlockSpec((tm, tk), lambda i, j, k: (i, k)),   # x
                w_spec,                                           # weight (Kp, Fp)
                pl.BlockSpec((1, tn), lambda i, j, k: (0, j)),    # bias
            ],
            out_specs=pl.BlockSpec((tm, tn), lambda i, j, k: (i, j)),
            scratch_shapes=[pltpu.VMEM((tm, tn), jnp.float32)],
        ),
        compiler_params=pltpu.CompilerParams(
            dimension_semantics=("parallel", "parallel", "arbitrary"),
            vmem_limit_bytes=vmem_limit,
        ),
        cost_estimate=cost,
    )(xp, wp, bp)

    return yp[:B, :F]


def _reference(x, weight, bias):
    y = x @ weight.T + bias[None, :]
    return jnp.clip(y, _QA_8B_LO, _QA_8B_HI)


def _make_inputs(key, B, in_features, out_features):
    kx, kw, kb = jax.random.split(key, 3)
    bound = 1.0 / jnp.sqrt(jnp.float32(in_features))
    x = jax.random.uniform(kx, (B, in_features), jnp.float32, minval=-2.0, maxval=2.0)
    weight = jax.random.uniform(kw, (out_features, in_features), jnp.float32,
                                minval=-bound, maxval=bound)
    bias = jax.random.uniform(kb, (out_features,), jnp.float32,
                              minval=-bound, maxval=bound)
    return x, weight, bias


if __name__ == "__main__":
    key = jax.random.PRNGKey(0)
    k1, k2 = jax.random.split(key)

    # 1) Small shapes consistent with nn.Linear(in_features, out_features):
    #    exact check with f32 operands (single-tile grid).
    B, in_features, out_features = 8, 32, 16
    x, w, b = _make_inputs(k1, B, in_features, out_features)
    params_f32 = prepare_fc_fpt_params(w, b, compute_dtype=jnp.float32)
    y = jax.block_until_ready(fullyconnected_fpt_forward(x, params_f32))
    y_ref = _reference(x, w, b)
    assert y.shape == (B, out_features)
    assert jnp.allclose(y, y_ref, atol=1e-5, rtol=1e-5), "f32 mismatch vs reference"

    # 2) Multi-tile shapes exercising the (M, N, K) grid + accumulator with the
    #    default bf16 operand path (f32 accumulate / epilogue).  B=272 -> one M
    #    tile (tm=272); F=300 -> Fp=384, tn=128 -> 3 parallel N tiles.
    B2, in2, out2 = 272, 640, 300
    x2, w2, b2 = _make_inputs(k2, B2, in2, out2)
    params_bf16 = prepare_fc_fpt_params(w2, b2)          # prepared once, reused
    y2 = jax.block_until_ready(fullyconnected_fpt_forward(x2, params_bf16))
    y2_ref = _reference(x2, w2, b2)
    assert y2.shape == (B2, out2)
    assert jnp.allclose(y2, y2_ref, atol=5e-2, rtol=5e-2), "bf16 mismatch vs reference"

    # Second call with the same prepared params (no weight re-prep in the hot path).
    y2b = jax.block_until_ready(fullyconnected_fpt_forward(x2, params_bf16))
    assert jnp.allclose(y2b, y2), "non-deterministic result across calls"

    print("KERNEL_OK")
</pallas_src>

<mosaic_0001>
module attributes {stable_mosaic.version = 11 : i64} {
  func.func @_fc_fpt_kernel(%arg0: i32, %arg1: i32, %arg2: i32, %arg3: memref<8x128xf32, #tpu.memory_space<vmem>>, %arg4: memref<128x128xf32, #tpu.memory_space<vmem>>, %arg5: memref<1x128xf32, #tpu.memory_space<vmem>>, %arg6: memref<8x128xf32, #tpu.memory_space<vmem>>, %arg7: memref<8x128xf32, #tpu.memory_space<vmem>>) attributes {dimension_semantics = [#tpu.dimension_semantics<parallel>, #tpu.dimension_semantics<parallel>, #tpu.dimension_semantics<arbitrary>], iteration_bounds = array<i64: 1, 1, 1>, scalar_prefetch = 0 : i64, scratch_operands = 1 : i64, tpu.core_type = #tpu.core_type<tc>, window_params = [{transform_indices = @transform_0, window_bounds = array<i64: 8, 128>}, {transform_indices = @transform_1, window_bounds = array<i64: 128, 128>}, {transform_indices = @transform_2, window_bounds = array<i64: 1, 128>}, {transform_indices = @transform_3, window_bounds = array<i64: 8, 128>}]} {
    %c0_i32 = arith.constant 0 : i32
    %0 = arith.cmpi eq, %arg2, %c0_i32 : i32
    %1 = arith.extui %0 : i1 to i32
    %c0_i32_0 = arith.constant 0 : i32
    %2 = arith.cmpi ne, %1, %c0_i32_0 : i32
    scf.if %2 {
      %cst_10 = arith.constant 0.000000e+00 : f32
      %12 = vector.broadcast %cst_10 : f32 to vector<8x128xf32>
      %c0_11 = arith.constant 0 : index
      %c0_12 = arith.constant 0 : index
      %13 = vector.load %arg7[%c0_11, %c0_12] : memref<8x128xf32, #tpu.memory_space<vmem>>, vector<8x128xf32>
      tpu.vector_store %arg7[%c0_11, %c0_12], %12 {strides = array<i32>} : memref<8x128xf32, #tpu.memory_space<vmem>>, vector<8x128xf32>,
    } else {
    }
    %c0 = arith.constant 0 : index
    %c0_1 = arith.constant 0 : index
    %3 = vector.load %arg7[%c0, %c0_1] : memref<8x128xf32, #tpu.memory_space<vmem>>, vector<8x128xf32>
    %c0_2 = arith.constant 0 : index
    %c0_3 = arith.constant 0 : index
    %4 = vector.load %arg3[%c0_2, %c0_3] : memref<8x128xf32, #tpu.memory_space<vmem>>, vector<8x128xf32>
    %c0_4 = arith.constant 0 : index
    %c0_5 = arith.constant 0 : index
    %5 = vector.load %arg4[%c0_4, %c0_5] : memref<128x128xf32, #tpu.memory_space<vmem>>, vector<128x128xf32>
    %cst = arith.constant dense<0.000000e+00> : vector<8x128xf32>
    %6 = tpu.matmul %4, %5, %cst {dimension_numbers = #tpu.dot_dimension_numbers<[1], [0], [0], [1], [0, 0, 1, 1], [], []>} : vector<8x128xf32>, vector<128x128xf32>, vector<8x128xf32> -> vector<8x128xf32>
    %7 = arith.addf %3, %6 : vector<8x128xf32>
    %c0_6 = arith.constant 0 : index
    %c0_7 = arith.constant 0 : index
    %8 = vector.load %arg7[%c0_6, %c0_7] : memref<8x128xf32, #tpu.memory_space<vmem>>, vector<8x128xf32>
    tpu.vector_store %arg7[%c0_6, %c0_7], %7 {strides = array<i32>} : memref<8x128xf32, #tpu.memory_space<vmem>>, vector<8x128xf32>,
    %c0_i32_8 = arith.constant 0 : i32
    %9 = arith.cmpi eq, %arg2, %c0_i32_8 : i32
    %10 = arith.extui %9 : i1 to i32
    %c0_i32_9 = arith.constant 0 : i32
    %11 = arith.cmpi ne, %10, %c0_i32_9 : i32
    scf.if %11 {
      %c0_10 = arith.constant 0 : index
      %c0_11 = arith.constant 0 : index
      %12 = vector.load %arg7[%c0_10, %c0_11] : memref<8x128xf32, #tpu.memory_space<vmem>>, vector<8x128xf32>
      %c0_12 = arith.constant 0 : index
      %c0_13 = arith.constant 0 : index
      %13 = vector.load %arg5[%c0_12, %c0_13] : memref<1x128xf32, #tpu.memory_space<vmem>>, vector<1x128xf32>
      %14 = vector.broadcast %13 : vector<1x128xf32> to vector<8x128xf32>
      %15 = arith.addf %12, %14 : vector<8x128xf32>
      %cst_14 = arith.constant -1.000000e+00 : f32
      %cst_15 = arith.constant 0.9921875 : f32
      %16 = vector.broadcast %cst_14 : f32 to vector<8x128xf32>
      %17 = arith.maximumf %16, %15 : vector<8x128xf32>
      %18 = vector.broadcast %cst_15 : f32 to vector<8x128xf32>
      %19 = arith.minimumf %18, %17 : vector<8x128xf32>
      %c0_16 = arith.constant 0 : index
      %c0_17 = arith.constant 0 : index
      %20 = vector.load %arg6[%c0_16, %c0_17] : memref<8x128xf32, #tpu.memory_space<vmem>>, vector<8x128xf32>
      tpu.vector_store %arg6[%c0_16, %c0_17], %19 {strides = array<i32>} : memref<8x128xf32, #tpu.memory_space<vmem>>, vector<8x128xf32>,
    } else {
    }
    return
  }
  func.func @transform_0(%arg0: i32, %arg1: i32, %arg2: i32) -> (i32, i32) {
    %c0_i32 = arith.constant 0 : i32
    return %arg0, %arg2 : i32, i32
  }
  func.func @transform_1(%arg0: i32, %arg1: i32, %arg2: i32) -> (i32, i32) {
    %c0_i32 = arith.constant 0 : i32
    return %arg2, %arg1 : i32, i32
  }
  func.func @transform_2(%arg0: i32, %arg1: i32, %arg2: i32) -> (i32, i32) {
    %c0_i32 = arith.constant 0 : i32
    %c0_i32_0 = arith.constant 0 : i32
    return %c0_i32, %arg1 : i32, i32
  }
  func.func @transform_3(%arg0: i32, %arg1: i32, %arg2: i32) -> (i32, i32) {
    %c0_i32 = arith.constant 0 : i32
    return %arg0, %arg1 : i32, i32
  }
}

</mosaic_0001>

<bundles_post_ra>
// kernel: tpu_custom_call.1
= control target key start
LH: loop header
LB: loop body
LE: loop exit
PB: predicated region body
PF: predicated region fallthrough
CT: control target
= control target key end

     0   :  { %8 = vsyncpa [#allocation4], 0  ;;  %s241_s0 = inlined_call_operand.hbm [shape: f32[8,128], index: 0, kind: input, shape index: {}]   ;;  %s242_s1 = inlined_call_operand.hbm [shape: f32[128,128], index: 1, kind: input, shape index: {}]   ;;  %s243_s2 = inlined_call_operand.vmem [shape: f32[1,128], index: 2, kind: input, shape index: {}]   ;;  %s244_s3 = inlined_call_operand.hbm [shape: f32[8,128], index: 3, kind: output, shape index: {}]  }
   0x1   :  { %9 = vsyncpa [#allocation7], 0 }
   0x2   :  { %10 = vsyncpa [#allocation5], 0  ;;  %s16_s14 = sshll.u32 %s241_s0, 4  ;;  %s204_s15 = smov [#allocation3]   ;;  %s17_s14 = int_to_ptr.hbm [resolvable:$true] %s16_s14 }
   0x3   :  { %s18_s16 = sshll.u32 %s204_s15, 4  ;;  %s26_s19 = sshll.u32 %s242_s1, 4  ;;  %s19_s16 = int_to_ptr.vmem [resolvable:$true] %s18_s16  ;;  %s27_s19 = int_to_ptr.hbm [resolvable:$true] %s26_s19 }
   0x4   :  { %21 = dma.hbm_to_vmem [thread:$0]  %s17_s14, 128, %s19_s16, [#allocation4]  }
   0x5   :  { %s205_s20 = smov [#allocation6]   ;;  %s206_s22 = smov 128  }
   0x6   :  { %s28_s21 = sshll.u32 %s205_s20, 4  ;;  %s207_s23 = smov 8   ;;  %s29_s21 = int_to_ptr.vmem [resolvable:$true] %s28_s21 }
   0x7   :  { %34 = dma.hbm_to_vmem [thread:$0]  %s27_s19, 2048, %s29_s21, [#allocation7], %s206_s22, %s206_s22, %s207_s23  }
   0x8   :  { %198 = dma.done.wait [#allocation4], 128  }
   0x9   :  { %199 = vsyncadd [#allocation4], 4294967168 }
   0xa   :  { %200 = dma.done.wait [#allocation7], 2048  }
   0xb   :  { %201 = vsyncadd [#allocation7], 4294965248  ;;  %v67_v0 = vld [vmem:[#allocation6 + $0x78] sm:$0xff]  ;;  %v66_v1 = vld [vmem:[#allocation6 + $0x70] sm:$0xff]  ;;  %s208_s24 = smov [#allocation8]   ;;  %s109_s28 = sshll.u32 %s244_s3, 4  ;;  %s110_s28 = int_to_ptr.hbm [resolvable:$true] %s109_s28 }
   0xc   :  { %68 = vmatpush.msra.mxu0 %v67_v0  ;;  %v65_v2 = vld [vmem:[#allocation6 + $0x68] sm:$0xff]  ;;  %v64_v3 = vld [vmem:[#allocation6 + $0x60] sm:$0xff]  ;;  %v63_v4 = vld [vmem:[#allocation6 + $0x58] sm:$0xff]  ;;  %s107_s25 = sshll.u32 %s208_s24, 4  ;;  %s108_s25 = int_to_ptr.vmem [resolvable:$true] %s107_s25 }
   0xd   :  { %v62_v5 = vld [vmem:[#allocation6 + $0x50] sm:$0xff]  ;;  %v61_v6 = vld [vmem:[#allocation6 + $0x48] sm:$0xff]  ;;  %v60_v7 = vld [vmem:[#allocation6 + $0x40] sm:$0xff] }
   0xe   :  { %69 = vmatpush.msra.mxu0 %v66_v1  ;;  %v59_v8 = vld [vmem:[#allocation6 + $0x38] sm:$0xff]  ;;  %v58_v9 = vld [vmem:[#allocation6 + $0x30] sm:$0xff]  ;;  %v57_v10 = vld [vmem:[#allocation6 + $0x28] sm:$0xff] }
   0xf   :  { %v56_v11 = vld [vmem:[#allocation6 + $0x20] sm:$0xff]  ;;  %v55_v12 = vld [vmem:[#allocation6 + $0x18] sm:$0xff]  ;;  %v54_v13 = vld [vmem:[#allocation6 + $0x10] sm:$0xff] }
  0x10   :  { %70 = vmatpush.msra.mxu0 %v65_v2  ;;  %v53_v14 = vld [vmem:[#allocation6 + $0x8] sm:$0xff]  ;;  %v52_v15 = vld [vmem:[#allocation6] sm:$0xff]  ;;  %v51_v16 = vld [vmem:[#allocation3] sm:$0xff] }
  0x11   :  { %v125_v17 = vld [vmem:[%s243_s2] ss:$0 sm:$0xff] }
  0x12   :  { %71 = vmatpush.msra.mxu0 %v64_v3 }
  0x14   :  { %72 = vmatpush.msra.mxu0 %v63_v4 }
  0x16   :  { %73 = vmatpush.msra.mxu0 %v62_v5 }
  0x18   :  { %74 = vmatpush.msra.mxu0 %v61_v6 }
  0x1a   :  { %75 = vmatpush.msra.mxu0 %v60_v7 }
  0x1c   :  { %76 = vmatpush.msra.mxu0 %v59_v8 }
  0x1e   :  { %77 = vmatpush.msra.mxu0 %v58_v9 }
  0x20   :  { %78 = vmatpush.msra.mxu0 %v57_v10 }
  0x22   :  { %79 = vmatpush.msra.mxu0 %v56_v11 }
  0x24   :  { %80 = vmatpush.msra.mxu0 %v55_v12 }
  0x26   :  { %81 = vmatpush.msra.mxu0 %v54_v13 }
  0x28   :  { %82 = vmatpush.msra.mxu0 %v53_v14 }
  0x2a   :  { %83 = vmatpush.msra.mxu0 %v52_v15 }
  0x2b   :  { %84 = vmatmul.f32.vlgmr.msra.gmra.mxu0 %v51_v16 }
  0xa8   :  { %v85_v18 = vpop.f32.mrf.mxu0 }
  0xa9   :  { %v98_v19 = vadd.f32 %v125_v17, %v85_v18 }
  0xab   :  { %v99_v20 = vmax.f32 %v98_v19, -1.0 }
  0xad   :  { %v100_v21 = vmin.f32 %v99_v20, 0.9921875 }
  0xaf   :  { %101 = vst [vmem:[#allocation8] sm:$0xff] %v100_v21 }
  0xb0   :  { %112 = dma.vmem_to_hbm [thread:$0]  %s108_s25, 128, %s110_s28, [#allocation5]  }
  0xb1   :  { %202 = dma.done.wait [#allocation5], 128  }
  0xb2   :  { %203 = vsyncadd [#allocation5], 4294967168 }
  0xb3   :  { %117 = vsyncpa [#allocation4], 1 }
  0xb4   :  { %118 = vsyncpa [#allocation7], 1 }
  0xb5   :  { %119 = vsyncpa [#allocation5], 1 }

</bundles_post_ra>
